<compile_context>
chip_gen: v7x
topology: tpu7x:2x2x1
jax: 0.10.0
libtpu: 0.0.40
codegen_flags: <defaults>
</compile_context>

<pallas_src>
import jax
import jax.numpy as jnp
from jax.experimental import pallas as pl
from jax.experimental.pallas import tpu as pltpu


_LANE = 128    # lane-dense padded feature width
_TM = 1024     # output / A row-block
_TK = 1024     # contraction block (A cols / X rows)


def _round_up(x, m):
    return ((x + m - 1) // m) * m


def _propagate_kernel(a_ref, x_ref, sum_ref, x_out_ref, sum_out_ref, acc_ref):
    """One (TM, DP) tile of A @ X, accumulated over the (last) K grid axis.

    a_ref:   (TM, TK) bf16 adjacency tile
    x_ref:   (TK, DP) bf16 embedding stripe
    sum_ref: (TM, DP) f32 running layer sum (resident across K, aliased to
             sum_out_ref's HBM buffer)
    x_out_ref:   (TM, DP) bf16 -- this layer's propagated embeddings
    sum_out_ref: (TM, DP) f32  -- running sum including this layer
    acc_ref: (TM, DP) f32 VMEM scratch
    """
    k = pl.program_id(1)

    @pl.when(k == 0)
    def _():
        acc_ref[...] = jnp.zeros_like(acc_ref)

    # Native bf16 x bf16 MXU matmul, f32 accumulation.
    acc_ref[...] += jnp.dot(a_ref[...], x_ref[...],
                            preferred_element_type=jnp.float32)

    @pl.when(k == pl.num_programs(1) - 1)
    def _():
        x_out_ref[...] = acc_ref[...].astype(x_out_ref.dtype)
        sum_out_ref[...] = sum_ref[...] + acc_ref[...]


def _propagate(a_bf16, x_bf16, sum_f32, *, tm, tk):
    """One LGConv propagation + fused running-sum update.

    Returns (x_new_bf16, sum_new_f32).
    """
    n_pad, dp = x_bf16.shape
    grid = (n_pad // tm, n_pad // tk)
    return pl.pallas_call(
        _propagate_kernel,
        out_shape=(
            jax.ShapeDtypeStruct((n_pad, dp), jnp.bfloat16),   # new X (bf16)
            jax.ShapeDtypeStruct((n_pad, dp), jnp.float32),    # new running sum
        ),
        grid=grid,
        in_specs=[
            pl.BlockSpec((tm, tk), lambda i, k: (i, k)),   # A tile (bf16)
            pl.BlockSpec((tk, dp), lambda i, k: (k, 0)),   # X stripe (bf16)
            pl.BlockSpec((tm, dp), lambda i, k: (i, 0)),   # running sum (f32, resident)
        ],
        out_specs=(
            pl.BlockSpec((tm, dp), lambda i, k: (i, 0)),   # new X
            pl.BlockSpec((tm, dp), lambda i, k: (i, 0)),   # new running sum
        ),
        scratch_shapes=[pltpu.VMEM((tm, dp), jnp.float32)],
        # Update the running sum in place (read at k==0 block load, written at
        # the last k) -- removes a separate HBM read-modify-write pass.
        input_output_aliases={2: 1},
        compiler_params=pltpu.CompilerParams(
            dimension_semantics=("parallel", "arbitrary")),
    )(a_bf16, x_bf16, sum_f32)


def lightgcn_forward(emb_users_w, emb_items_w, edge_index, num_layers=4):
    """Pallas-backed LightGCN forward.

    emb_users_w: (U, D) f32, emb_items_w: (I, D) f32, edge_index: (2, E) i32.
    Returns (emb_users_final, emb_users_w, emb_items_final, emb_items_w).
    """
    num_users, dim_h = emb_users_w.shape
    num_items = emb_items_w.shape[0]
    n = num_users + num_items

    dp = _round_up(dim_h, _LANE)            # lane-dense feature width (64 -> 128)
    n_pad = _round_up(n, 256)               # tile-friendly node count
    tm = min(_TM, n_pad)
    tk = min(_TK, n_pad)
    n_pad = _round_up(n_pad, max(tm, tk))   # divisible by both tm and tk
    if n_pad // tm < 2 and n_pad >= 512:
        tm = n_pad // 2                     # keep >=2 row blocks for v7x megacore

    # Layer-0 embeddings, zero-padded to (n_pad, dp).
    emb0 = jnp.concatenate([emb_users_w, emb_items_w], axis=0).astype(jnp.float32)
    x0 = jnp.zeros((n_pad, dp), jnp.float32).at[:n, :dim_h].set(emb0)

    # ---- glue: PyG gcn_norm(add_self_loops=False) -> dense normalized A ----
    row = edge_index[0].astype(jnp.int32)   # source nodes
    col = edge_index[1].astype(jnp.int32)   # destination nodes
    ones = jnp.ones(row.shape, dtype=jnp.float32)
    deg = jnp.zeros((n_pad,), jnp.float32).at[col].add(ones)     # dst in-degree
    deg_inv_sqrt = jnp.where(deg > 0, jax.lax.rsqrt(jnp.maximum(deg, 1.0)), 0.0)
    norm = deg_inv_sqrt[row] * deg_inv_sqrt[col]                 # per-edge weight
    # out[dst] += norm * x[src]   <=>   out = A @ x  with  A[dst, src] = norm.
    # Built directly in bf16: no transient f32 N_pad^2 buffer / extra traffic.
    a_bf16 = (jnp.zeros((n_pad, n_pad), jnp.bfloat16)
              .at[col, row].add(norm.astype(jnp.bfloat16)))
    # TODO(synk): chip-specific A quantization (fp8 on v7x, int8 on v5e/v6e) and a
    # CSR + PrefetchScalarGridSpec gather kernel for production graph sizes
    # (O(E*D) traffic instead of dense O(N^2)).

    x = x0.astype(jnp.bfloat16)             # bf16 X stream between layers
    acc = x0                                 # f32 running sum, starts at embs[0]
    for _ in range(num_layers):
        x, acc = _propagate(a_bf16, x, acc, tm=tm, tk=tk)

    scale = 1.0 / float((num_layers + 1) ** 2)
    emb_final = (acc * scale)[:n, :dim_h]

    emb_users_final = emb_final[:num_users]
    emb_items_final = emb_final[num_users:]
    return emb_users_final, emb_users_w, emb_items_final, emb_items_w


def _reference(emb_users_w, emb_items_w, edge_index, num_layers=4):
    """Pure-JAX f32 reference for a correctness check."""
    num_users = emb_users_w.shape[0]
    n = num_users + emb_items_w.shape[0]
    emb = jnp.concatenate([emb_users_w, emb_items_w], axis=0)
    row, col = edge_index[0], edge_index[1]
    deg = jnp.zeros((n,), jnp.float32).at[col].add(1.0)
    dis = jnp.where(deg > 0, jnp.where(deg > 0, deg, 1.0) ** -0.5, 0.0)
    norm = dis[row] * dis[col]
    embs = [emb]
    for _ in range(num_layers):
        msg = norm[:, None] * emb[row]
        emb = jnp.zeros_like(emb).at[col].add(msg)
        embs.append(emb)
    emb_final = (1.0 / (num_layers + 1)) * jnp.mean(jnp.stack(embs, axis=1), axis=1)
    return emb_final[:num_users], emb_final[num_users:]


if __name__ == "__main__":
    # Small synthetic LightGCN instance (default dim_h=64, num_layers=4).
    num_users, num_items, dim_h, num_layers = 40, 88, 64, 4
    n = num_users + num_items
    num_interactions = 512

    key = jax.random.PRNGKey(0)
    k_u, k_i, k_src, k_dst = jax.random.split(key, 4)

    # nn.init.normal_(std=0.01) on both embedding tables.
    emb_users_w = (0.01 * jax.random.normal(k_u, (num_users, dim_h))).astype(jnp.float32)
    emb_items_w = (0.01 * jax.random.normal(k_i, (num_items, dim_h))).astype(jnp.float32)

    # Synthetic bipartite interactions; item node ids offset by num_users so
    # they address rows of cat([users, items]).  Edges are added in both
    # directions so both user and item degrees are nonzero and the propagation
    # path (A @ X matmuls) is actually exercised.
    u = jax.random.randint(k_src, (num_interactions,), 0, num_users, dtype=jnp.int32)
    it = jax.random.randint(k_dst, (num_interactions,), num_users, n, dtype=jnp.int32)
    edge_index = jnp.stack([jnp.concatenate([u, it]),
                            jnp.concatenate([it, u])], axis=0)   # (2, 1024)

    fwd = jax.jit(lightgcn_forward, static_argnames=("num_layers",))
    outs = fwd(emb_users_w, emb_items_w, edge_index, num_layers=num_layers)
    outs = jax.block_until_ready(outs)
    emb_users_final, _, emb_items_final, _ = outs

    ref_u, ref_i = _reference(emb_users_w, emb_items_w, edge_index, num_layers)
    assert emb_users_final.shape == (num_users, dim_h)
    assert emb_items_final.shape == (num_items, dim_h)

    # bf16 adjacency + bf16 inter-layer X + f32 accumulation: error bounded by
    # a few percent of the tensor scale.
    ref_scale = float(jnp.max(jnp.abs(jnp.concatenate([ref_u, ref_i]))))
    err_u = float(jnp.max(jnp.abs(emb_users_final - ref_u)))
    err_i = float(jnp.max(jnp.abs(emb_items_final - ref_i)))
    tol = 5e-2 * ref_scale + 1e-6
    assert err_u <= tol, (err_u, tol)
    assert err_i <= tol, (err_i, tol)

    print("KERNEL_OK")
</pallas_src>

<mosaic_0001>
module attributes {stable_mosaic.version = 11 : i64} {
  func.func private @main(%arg0: i32) attributes {dimension_semantics = [#tpu.dimension_semantics<core_parallel>], iteration_bounds = array<i64: 2>, tpu.core_type = #tpu.core_type<sc_scalar_subcore>, window_params = []} {
    return
  }
}

module attributes {stable_mosaic.version = 11 : i64} {
  func.func private @main(%arg0: i32) attributes {dimension_semantics = [#tpu.dimension_semantics<core_parallel>], iteration_bounds = array<i64: 2>, tpu.core_type = #tpu.core_type<sc_scalar_subcore>, window_params = []} {
    return
  }
}

module attributes {stable_mosaic.version = 11 : i64} {
  func.func @_propagate_kernel(%arg0: i32, %arg1: i32, %arg2: memref<256x256xbf16, #tpu.memory_space<vmem>>, %arg3: memref<256x128xbf16, #tpu.memory_space<vmem>>, %arg4: memref<256x128xf32, #tpu.memory_space<vmem>>, %arg5: memref<256x128xbf16, #tpu.memory_space<vmem>>, %arg6: memref<256x128xf32, #tpu.memory_space<vmem>>, %arg7: memref<256x128xf32, #tpu.memory_space<vmem>>) attributes {dimension_semantics = [#tpu.dimension_semantics<parallel>, #tpu.dimension_semantics<arbitrary>], iteration_bounds = array<i64: 1, 1>, scalar_prefetch = 0 : i64, scratch_operands = 1 : i64, tpu.core_type = #tpu.core_type<tc>, window_params = [{transform_indices = @transform_0, window_bounds = array<i64: 256, 256>}, {transform_indices = @transform_1, window_bounds = array<i64: 256, 128>}, {transform_indices = @transform_2, window_bounds = array<i64: 256, 128>}, {transform_indices = @transform_3, window_bounds = array<i64: 256, 128>}, {transform_indices = @transform_4, window_bounds = array<i64: 256, 128>}]} {
    %c0_i32 = arith.constant 0 : i32
    %0 = arith.cmpi eq, %arg1, %c0_i32 : i32
    %1 = arith.extui %0 : i1 to i32
    %c0_i32_0 = arith.constant 0 : i32
    %2 = arith.cmpi ne, %1, %c0_i32_0 : i32
    scf.if %2 {
      %cst_10 = arith.constant 0.000000e+00 : f32
      %12 = vector.broadcast %cst_10 : f32 to vector<256x128xf32>
      %c0_11 = arith.constant 0 : index
      %c0_12 = arith.constant 0 : index
      %13 = vector.load %arg7[%c0_11, %c0_12] : memref<256x128xf32, #tpu.memory_space<vmem>>, vector<256x128xf32>
      tpu.vector_store %arg7[%c0_11, %c0_12], %12 {strides = array<i32>} : memref<256x128xf32, #tpu.memory_space<vmem>>, vector<256x128xf32>,
    } else {
    }
    %c0 = arith.constant 0 : index
    %c0_1 = arith.constant 0 : index
    %3 = vector.load %arg7[%c0, %c0_1] : memref<256x128xf32, #tpu.memory_space<vmem>>, vector<256x128xf32>
    %c0_2 = arith.constant 0 : index
    %c0_3 = arith.constant 0 : index
    %4 = vector.load %arg2[%c0_2, %c0_3] : memref<256x256xbf16, #tpu.memory_space<vmem>>, vector<256x256xbf16>
    %c0_4 = arith.constant 0 : index
    %c0_5 = arith.constant 0 : index
    %5 = vector.load %arg3[%c0_4, %c0_5] : memref<256x128xbf16, #tpu.memory_space<vmem>>, vector<256x128xbf16>
    %cst = arith.constant dense<0.000000e+00> : vector<256x128xf32>
    %6 = tpu.matmul %4, %5, %cst {dimension_numbers = #tpu.dot_dimension_numbers<[1], [0], [0], [1], [0, 0, 1, 1], [], []>} : vector<256x256xbf16>, vector<256x128xbf16>, vector<256x128xf32> -> vector<256x128xf32>
    %7 = arith.addf %3, %6 : vector<256x128xf32>
    %c0_6 = arith.constant 0 : index
    %c0_7 = arith.constant 0 : index
    %8 = vector.load %arg7[%c0_6, %c0_7] : memref<256x128xf32, #tpu.memory_space<vmem>>, vector<256x128xf32>
    tpu.vector_store %arg7[%c0_6, %c0_7], %7 {strides = array<i32>} : memref<256x128xf32, #tpu.memory_space<vmem>>, vector<256x128xf32>,
    %c0_i32_8 = arith.constant 0 : i32
    %9 = arith.cmpi eq, %arg1, %c0_i32_8 : i32
    %10 = arith.extui %9 : i1 to i32
    %c0_i32_9 = arith.constant 0 : i32
    %11 = arith.cmpi ne, %10, %c0_i32_9 : i32
    scf.if %11 {
      %c0_10 = arith.constant 0 : index
      %c0_11 = arith.constant 0 : index
      %12 = vector.load %arg7[%c0_10, %c0_11] : memref<256x128xf32, #tpu.memory_space<vmem>>, vector<256x128xf32>
      %13 = arith.truncf %12 : vector<256x128xf32> to vector<256x128xbf16>
      %c0_12 = arith.constant 0 : index
      %c0_13 = arith.constant 0 : index
      %14 = vector.load %arg5[%c0_12, %c0_13] : memref<256x128xbf16, #tpu.memory_space<vmem>>, vector<256x128xbf16>
      tpu.vector_store %arg5[%c0_12, %c0_13], %13 {strides = array<i32>} : memref<256x128xbf16, #tpu.memory_space<vmem>>, vector<256x128xbf16>,
      %c0_14 = arith.constant 0 : index
      %c0_15 = arith.constant 0 : index
      %15 = vector.load %arg4[%c0_14, %c0_15] : memref<256x128xf32, #tpu.memory_space<vmem>>, vector<256x128xf32>
      %c0_16 = arith.constant 0 : index
      %c0_17 = arith.constant 0 : index
      %16 = vector.load %arg7[%c0_16, %c0_17] : memref<256x128xf32, #tpu.memory_space<vmem>>, vector<256x128xf32>
      %17 = arith.addf %15, %16 : vector<256x128xf32>
      %c0_18 = arith.constant 0 : index
      %c0_19 = arith.constant 0 : index
      %18 = vector.load %arg6[%c0_18, %c0_19] : memref<256x128xf32, #tpu.memory_space<vmem>>, vector<256x128xf32>
      tpu.vector_store %arg6[%c0_18, %c0_19], %17 {strides = array<i32>} : memref<256x128xf32, #tpu.memory_space<vmem>>, vector<256x128xf32>,
    } else {
    }
    return
  }
  func.func @transform_0(%arg0: i32, %arg1: i32) -> (i32, i32) {
    %c0_i32 = arith.constant 0 : i32
    return %arg0, %arg1 : i32, i32
  }
  func.func @transform_1(%arg0: i32, %arg1: i32) -> (i32, i32) {
    %c0_i32 = arith.constant 0 : i32
    %c0_i32_0 = arith.constant 0 : i32
    return %arg1, %c0_i32 : i32, i32
  }
  func.func @transform_2(%arg0: i32, %arg1: i32) -> (i32, i32) {
    %c0_i32 = arith.constant 0 : i32
    %c0_i32_0 = arith.constant 0 : i32
    return %arg0, %c0_i32 : i32, i32
  }
  func.func @transform_3(%arg0: i32, %arg1: i32) -> (i32, i32) {
    %c0_i32 = arith.constant 0 : i32
    %c0_i32_0 = arith.constant 0 : i32
    return %arg0, %c0_i32 : i32, i32
  }
  func.func @transform_4(%arg0: i32, %arg1: i32) -> (i32, i32) {
    %c0_i32 = arith.constant 0 : i32
    %c0_i32_0 = arith.constant 0 : i32
    return %arg0, %c0_i32 : i32, i32
  }
}

module attributes {stable_mosaic.version = 11 : i64} {
  func.func @_propagate_kernel(%arg0: i32, %arg1: i32, %arg2: memref<256x256xbf16, #tpu.memory_space<vmem>>, %arg3: memref<256x128xbf16, #tpu.memory_space<vmem>>, %arg4: memref<256x128xf32, #tpu.memory_space<vmem>>, %arg5: memref<256x128xbf16, #tpu.memory_space<vmem>>, %arg6: memref<256x128xf32, #tpu.memory_space<vmem>>, %arg7: memref<256x128xf32, #tpu.memory_space<vmem>>) attributes {dimension_semantics = [#tpu.dimension_semantics<parallel>, #tpu.dimension_semantics<arbitrary>], iteration_bounds = array<i64: 1, 1>, scalar_prefetch = 0 : i64, scratch_operands = 1 : i64, tpu.core_type = #tpu.core_type<tc>, window_params = [{transform_indices = @transform_0, window_bounds = array<i64: 256, 256>}, {transform_indices = @transform_1, window_bounds = array<i64: 256, 128>}, {transform_indices = @transform_2, window_bounds = array<i64: 256, 128>}, {transform_indices = @transform_3, window_bounds = array<i64: 256, 128>}, {transform_indices = @transform_4, window_bounds = array<i64: 256, 128>}]} {
    %c0_i32 = arith.constant 0 : i32
    %0 = arith.cmpi eq, %arg1, %c0_i32 : i32
    %1 = arith.extui %0 : i1 to i32
    %c0_i32_0 = arith.constant 0 : i32
    %2 = arith.cmpi ne, %1, %c0_i32_0 : i32
    scf.if %2 {
      %cst_10 = arith.constant 0.000000e+00 : f32
      %12 = vector.broadcast %cst_10 : f32 to vector<256x128xf32>
      %c0_11 = arith.constant 0 : index
      %c0_12 = arith.constant 0 : index
      %13 = vector.load %arg7[%c0_11, %c0_12] : memref<256x128xf32, #tpu.memory_space<vmem>>, vector<256x128xf32>
      tpu.vector_store %arg7[%c0_11, %c0_12], %12 {strides = array<i32>} : memref<256x128xf32, #tpu.memory_space<vmem>>, vector<256x128xf32>,
    } else {
    }
    %c0 = arith.constant 0 : index
    %c0_1 = arith.constant 0 : index
    %3 = vector.load %arg7[%c0, %c0_1] : memref<256x128xf32, #tpu.memory_space<vmem>>, vector<256x128xf32>
    %c0_2 = arith.constant 0 : index
    %c0_3 = arith.constant 0 : index
    %4 = vector.load %arg2[%c0_2, %c0_3] : memref<256x256xbf16, #tpu.memory_space<vmem>>, vector<256x256xbf16>
    %c0_4 = arith.constant 0 : index
    %c0_5 = arith.constant 0 : index
    %5 = vector.load %arg3[%c0_4, %c0_5] : memref<256x128xbf16, #tpu.memory_space<vmem>>, vector<256x128xbf16>
    %cst = arith.constant dense<0.000000e+00> : vector<256x128xf32>
    %6 = tpu.matmul %4, %5, %cst {dimension_numbers = #tpu.dot_dimension_numbers<[1], [0], [0], [1], [0, 0, 1, 1], [], []>} : vector<256x256xbf16>, vector<256x128xbf16>, vector<256x128xf32> -> vector<256x128xf32>
    %7 = arith.addf %3, %6 : vector<256x128xf32>
    %c0_6 = arith.constant 0 : index
    %c0_7 = arith.constant 0 : index
    %8 = vector.load %arg7[%c0_6, %c0_7] : memref<256x128xf32, #tpu.memory_space<vmem>>, vector<256x128xf32>
    tpu.vector_store %arg7[%c0_6, %c0_7], %7 {strides = array<i32>} : memref<256x128xf32, #tpu.memory_space<vmem>>, vector<256x128xf32>,
    %c0_i32_8 = arith.constant 0 : i32
    %9 = arith.cmpi eq, %arg1, %c0_i32_8 : i32
    %10 = arith.extui %9 : i1 to i32
    %c0_i32_9 = arith.constant 0 : i32
    %11 = arith.cmpi ne, %10, %c0_i32_9 : i32
    scf.if %11 {
      %c0_10 = arith.constant 0 : index
      %c0_11 = arith.constant 0 : index
      %12 = vector.load %arg7[%c0_10, %c0_11] : memref<256x128xf32, #tpu.memory_space<vmem>>, vector<256x128xf32>
      %13 = arith.truncf %12 : vector<256x128xf32> to vector<256x128xbf16>
      %c0_12 = arith.constant 0 : index
      %c0_13 = arith.constant 0 : index
      %14 = vector.load %arg5[%c0_12, %c0_13] : memref<256x128xbf16, #tpu.memory_space<vmem>>, vector<256x128xbf16>
      tpu.vector_store %arg5[%c0_12, %c0_13], %13 {strides = array<i32>} : memref<256x128xbf16, #tpu.memory_space<vmem>>, vector<256x128xbf16>,
      %c0_14 = arith.constant 0 : index
      %c0_15 = arith.constant 0 : index
      %15 = vector.load %arg4[%c0_14, %c0_15] : memref<256x128xf32, #tpu.memory_space<vmem>>, vector<256x128xf32>
      %c0_16 = arith.constant 0 : index
      %c0_17 = arith.constant 0 : index
      %16 = vector.load %arg7[%c0_16, %c0_17] : memref<256x128xf32, #tpu.memory_space<vmem>>, vector<256x128xf32>
      %17 = arith.addf %15, %16 : vector<256x128xf32>
      %c0_18 = arith.constant 0 : index
      %c0_19 = arith.constant 0 : index
      %18 = vector.load %arg6[%c0_18, %c0_19] : memref<256x128xf32, #tpu.memory_space<vmem>>, vector<256x128xf32>
      tpu.vector_store %arg6[%c0_18, %c0_19], %17 {strides = array<i32>} : memref<256x128xf32, #tpu.memory_space<vmem>>, vector<256x128xf32>,
    } else {
    }
    return
  }
  func.func @transform_0(%arg0: i32, %arg1: i32) -> (i32, i32) {
    %c0_i32 = arith.constant 0 : i32
    return %arg0, %arg1 : i32, i32
  }
  func.func @transform_1(%arg0: i32, %arg1: i32) -> (i32, i32) {
    %c0_i32 = arith.constant 0 : i32
    %c0_i32_0 = arith.constant 0 : i32
    return %arg1, %c0_i32 : i32, i32
  }
  func.func @transform_2(%arg0: i32, %arg1: i32) -> (i32, i32) {
    %c0_i32 = arith.constant 0 : i32
    %c0_i32_0 = arith.constant 0 : i32
    return %arg0, %c0_i32 : i32, i32
  }
  func.func @transform_3(%arg0: i32, %arg1: i32) -> (i32, i32) {
    %c0_i32 = arith.constant 0 : i32
    %c0_i32_0 = arith.constant 0 : i32
    return %arg0, %c0_i32 : i32, i32
  }
  func.func @transform_4(%arg0: i32, %arg1: i32) -> (i32, i32) {
    %c0_i32 = arith.constant 0 : i32
    %c0_i32_0 = arith.constant 0 : i32
    return %arg0, %c0_i32 : i32, i32
  }
}

</mosaic_0001>

<bundles_post_ra>
// kernel: lightgcn_forward.7
= control target key start
LH: loop header
LB: loop body
LE: loop exit
PB: predicated region body
PF: predicated region fallthrough
CT: control target
= control target key end

     0   :  { %s1776_s0 = inlined_call_operand.vmem [shape: bf16[256,256], index: 0, kind: input, shape index: {}]   ;;  %s1777_s1 = inlined_call_operand.vmem [shape: bf16[256,128], index: 1, kind: input, shape index: {}]   ;;  %s1778_s2 = inlined_call_operand.vmem [shape: f32[256,128], index: 2, kind: input, shape index: {}, may-alias: {2,4}]   ;;  %s1779_s3 = inlined_call_operand.hbm [shape: bf16[256,128], index: 3, kind: output, shape index: {0}]   ;;  %s1780_s4 = inlined_call_operand.vmem [shape: f32[256,128], index: 4, kind: output, shape index: {1}, may-alias: {2,4}]  }
   0x1   :  { %v1312_v0 = vld [vmem:[%s1777_s1 + $0x40] sm:$0xff]   ;;  %v1314_v2 = vld [vmem:[%s1777_s1 + $0x48] sm:$0xff]   ;;  %v1316_v4 = vld [vmem:[%s1777_s1 + $0x50] sm:$0xff]  }
   0x2   :  { %v1313_v1 = vld [vmem:[%s1777_s1] sm:$0xff]   ;;  %1181 = vmatprep.subr.bf16.mxu0 %v1312_v0  ;;  %1293 = vmatprep.subr.bf16.mxu1 %v1312_v0  ;;  %v1315_v3 = vld [vmem:[%s1777_s1 + $0x8] sm:$0xff]   ;;  %v1317_v5 = vld [vmem:[%s1777_s1 + $0x10] sm:$0xff]  }
   0x3   :  { %1182 = vmatpush3.bf16.msra.mxu0 %v1313_v1  ;;  %1301 = vmatpush3.bf16.msra.mxu1 %v1313_v1  ;;  %v1318_v6 = vld [vmem:[%s1777_s1 + $0x58] sm:$0xff]   ;;  %v1320_v8 = vld [vmem:[%s1777_s1 + $0x60] sm:$0xff]   ;;  %v1322_v10 = vld [vmem:[%s1777_s1 + $0x68] sm:$0xff]  }
   0x4   :  { %1183 = vmatprep.subr.bf16.mxu0 %v1314_v2  ;;  %1294 = vmatprep.subr.bf16.mxu1 %v1314_v2  ;;  %v1319_v7 = vld [vmem:[%s1777_s1 + $0x18] sm:$0xff]   ;;  %v1321_v9 = vld [vmem:[%s1777_s1 + $0x20] sm:$0xff]   ;;  %v1323_v13 = vld [vmem:[%s1777_s1 + $0x28] sm:$0xff]  }
   0x5   :  { %v1330_v11 = vld [vmem:[%s1776_s0 + $0x4] ss:$8 sps:$4 sm:$0xff]   ;;  %v1324_v14 = vld [vmem:[%s1777_s1 + $0x70] sm:$0xff]   ;;  %v1326_v16 = vld [vmem:[%s1777_s1 + $0x78] sm:$0xff]  }
   0x6   :  { %v1333_v12 = vld [vmem:[%s1776_s0 + $0x84] ss:$8 sps:$4 sm:$0xff]   ;;  %438 = vmatprep.mubr.bf16.mxu0 %v1330_v11  ;;  %v1325_v15 = vld [vmem:[%s1777_s1 + $0x30] sm:$0xff]   ;;  %v1327_v17 = vld [vmem:[%s1777_s1 + $0x38] sm:$0xff]  }
   0x7   :  { %1184 = vmatpush3.bf16.msra.mxu0 %v1315_v3  ;;  %1302 = vmatpush3.bf16.msra.mxu1 %v1315_v3  ;;  %v1328_v18 = vld [vmem:[%s1776_s0] ss:$8 sps:$4 sm:$0xff]   ;;  %v1334_v20 = vld [vmem:[%s1776_s0 + $0x14] ss:$8 sps:$4 sm:$0xff]  }
   0x8   :  { %1185 = vmatprep.subr.bf16.mxu0 %v1316_v4  ;;  %1295 = vmatprep.subr.bf16.mxu1 %v1316_v4  ;;  %v1331_v19 = vld [vmem:[%s1776_s0 + $0x80] ss:$8 sps:$4 sm:$0xff]   ;;  %v1336_v21 = vld [vmem:[%s1776_s0 + $0x94] ss:$8 sps:$4 sm:$0xff]  }
   0x9   :  { %502 = vmatprep.mubr.bf16.mxu1 %v1333_v12 }
   0xb   :  { %1186 = vmatpush3.bf16.msra.mxu0 %v1317_v5  ;;  %1303 = vmatpush3.bf16.msra.mxu1 %v1317_v5 }
   0xc   :  { %1187 = vmatprep.subr.bf16.mxu0 %v1318_v6  ;;  %1296 = vmatprep.subr.bf16.mxu1 %v1318_v6 }
   0xf   :  { %1188 = vmatpush3.bf16.msra.mxu0 %v1319_v7  ;;  %1304 = vmatpush3.bf16.msra.mxu1 %v1319_v7 }
  0x10   :  { %1189 = vmatprep.subr.bf16.mxu0 %v1320_v8  ;;  %1297 = vmatprep.subr.bf16.mxu1 %v1320_v8 }
  0x13   :  { %1190 = vmatpush3.bf16.msra.mxu0 %v1321_v9  ;;  %1305 = vmatpush3.bf16.msra.mxu1 %v1321_v9 }
  0x14   :  { %1191 = vmatprep.subr.bf16.mxu0 %v1322_v10  ;;  %1298 = vmatprep.subr.bf16.mxu1 %v1322_v10 }
  0x17   :  { %1192 = vmatpush3.bf16.msra.mxu0 %v1323_v13  ;;  %1306 = vmatpush3.bf16.msra.mxu1 %v1323_v13 }
  0x18   :  { %1193 = vmatprep.subr.bf16.mxu0 %v1324_v14  ;;  %1299 = vmatprep.subr.bf16.mxu1 %v1324_v14 }
  0x1b   :  { %1194 = vmatpush3.bf16.msra.mxu0 %v1325_v15  ;;  %1307 = vmatpush3.bf16.msra.mxu1 %v1325_v15 }
  0x1c   :  { %1195 = vmatprep.subr.bf16.mxu0 %v1326_v16  ;;  %1300 = vmatprep.subr.bf16.mxu1 %v1326_v16 }
  0x1f   :  { %1196 = vmatpush3.bf16.msra.mxu0 %v1327_v17  ;;  %1308 = vmatpush3.bf16.msra.mxu1 %v1327_v17 }
  0x22   :  { %439 = vmatmul.mubr.bf16.vlgmr.msra.gmra.mrb[0].mxu0 %v1328_v18  ;;  %503 = vmatmul.mubr.bf16.vlgmr.msra.gmra.mrb[0].mxu1 %v1331_v19 }
  0x23   :  { %446 = vmatprep.mubr.bf16.mxu0 %v1334_v20  ;;  %510 = vmatprep.mubr.bf16.mxu1 %v1336_v21 }
  0x24   :  { %10 = vsyncpa [#allocation4], 0  ;;  %v1338_v22 = vld [vmem:[%s1776_s0 + $0x10] ss:$8 sps:$4 sm:$0xff]   ;;  %v1340_v24 = vld [vmem:[%s1776_s0 + $0x24] ss:$8 sps:$4 sm:$0xff]  }
  0x25   :  { %v1339_v23 = vld [vmem:[%s1776_s0 + $0x90] ss:$8 sps:$4 sm:$0xff]   ;;  %v1342_v25 = vld [vmem:[%s1776_s0 + $0xa4] ss:$8 sps:$4 sm:$0xff]   ;;  %v1344_v26 = vld [vmem:[%s1776_s0 + $0x20] ss:$8 sps:$4 sm:$0xff]  }
  0x26   :  { %v1345_v27 = vld [vmem:[%s1776_s0 + $0xa0] ss:$8 sps:$4 sm:$0xff]   ;;  %v1346_v28 = vld [vmem:[%s1776_s0 + $0x34] ss:$8 sps:$4 sm:$0xff]   ;;  %v1350_v30 = vld [vmem:[%s1776_s0 + $0x30] ss:$8 sps:$4 sm:$0xff]  }
  0x27   :  { %v1348_v29 = vld [vmem:[%s1776_s0 + $0xb4] ss:$8 sps:$4 sm:$0xff]   ;;  %v1351_v31 = vld [vmem:[%s1776_s0 + $0xb0] ss:$8 sps:$4 sm:$0xff]   ;;  %v1352_v32 = vld [vmem:[%s1776_s0 + $0x44] ss:$8 sps:$4 sm:$0xff]  }
  0x28   :  { %v1354_v33 = vld [vmem:[%s1776_s0 + $0xc4] ss:$8 sps:$4 sm:$0xff]   ;;  %v1356_v34 = vld [vmem:[%s1776_s0 + $0x40] ss:$8 sps:$4 sm:$0xff]   ;;  %v1358_v36 = vld [vmem:[%s1776_s0 + $0x54] ss:$8 sps:$4 sm:$0xff]  }
  0x29   :  { %v1357_v35 = vld [vmem:[%s1776_s0 + $0xc0] ss:$8 sps:$4 sm:$0xff]   ;;  %v1360_v37 = vld [vmem:[%s1776_s0 + $0xd4] ss:$8 sps:$4 sm:$0xff]   ;;  %v1362_v38 = vld [vmem:[%s1776_s0 + $0x50] ss:$8 sps:$4 sm:$0xff]  }
  0x2a   :  { %447 = vmatmul.mubr.bf16.gmra.mrb[4].mxu0 %v1338_v22  ;;  %511 = vmatmul.mubr.bf16.gmra.mrb[4].mxu1 %v1339_v23  ;;  %v1363_v39 = vld [vmem:[%s1776_s0 + $0xd0] ss:$8 sps:$4 sm:$0xff]   ;;  %v1364_v40 = vld [vmem:[%s1776_s0 + $0x64] ss:$8 sps:$4 sm:$0xff]   ;;  %v1368_v42 = vld [vmem:[%s1776_s0 + $0x60] ss:$8 sps:$4 sm:$0xff]  }
  0x2b   :  { %454 = vmatprep.mubr.bf16.mxu0 %v1340_v24  ;;  %518 = vmatprep.mubr.bf16.mxu1 %v1342_v25  ;;  %v1366_v41 = vld [vmem:[%s1776_s0 + $0xe4] ss:$8 sps:$4 sm:$0xff]   ;;  %v1369_v43 = vld [vmem:[%s1776_s0 + $0xe0] ss:$8 sps:$4 sm:$0xff]   ;;  %v1370_v44 = vld [vmem:[%s1776_s0 + $0x74] ss:$8 sps:$4 sm:$0xff]  }
  0x2c   :  { %v1372_v45 = vld [vmem:[%s1776_s0 + $0xf4] ss:$8 sps:$4 sm:$0xff]   ;;  %v1374_v46 = vld [vmem:[%s1776_s0 + $0x70] ss:$8 sps:$4 sm:$0xff]   ;;  %v826_v51 = vld [vmem:[%s1778_s2] sm:$0xff] }
  0x2d   :  { %v1375_v47 = vld [vmem:[%s1776_s0 + $0xf0] ss:$8 sps:$4 sm:$0xff]   ;;  %v842_v53 = vld [vmem:[%s1778_s2 + $0x80] sm:$0xff]  ;;  %v827_v59 = vld [vmem:[%s1778_s2 + $0x8] sm:$0xff]  ;;  %s1400_s0 = smov [#allocation3]  }
  0x2e   :  { %v843_v61 = vld [vmem:[%s1778_s2 + $0x88] sm:$0xff]  ;;  %s959_s8 = sshll.u32 %s1400_s0, 4  ;;  %s960_s8 = int_to_ptr.vmem [resolvable:$true] %s959_s8 }
  0x2f   :  { %s1376_s20 = scalar_lea.vmem %s960_s8, 2048  ;;  %p1381_p1 = scmp.lt.s32.totalorder %s960_s8, %s960_s8 }
  0x30   :  { %p1377_p0 = scmp.ne.s32.totalorder %s960_s8, %s1376_s20  ;;  %p1382_p2 = scmp.lt.s32.totalorder %s1376_s20, %s1376_s20 }
  0x32   :  { %455 = vmatmul.mubr.bf16.gmra.mrb[8].mxu0 %v1344_v26  ;;  %519 = vmatmul.mubr.bf16.gmra.mrb[8].mxu1 %v1345_v27  ;;  %p1383_p3 = por %p1382_p2, %p1381_p1 }
  0x33   :  { %462 = vmatprep.mubr.bf16.mxu0 %v1346_v28  ;;  %526 = vmatprep.mubr.bf16.mxu1 %v1348_v29 }
  0x34   :  { %p1384_p4 = pnand %p1383_p3, %p1377_p0 }
  0x3a   :  { %463 = vmatmul.mubr.bf16.gmra.mrb[12].mxu0 %v1350_v30  ;;  %527 = vmatmul.mubr.bf16.gmra.mrb[12].mxu1 %v1351_v31 }
  0x3b   :  { %470 = vmatprep.mubr.bf16.mxu0 %v1352_v32  ;;  %534 = vmatprep.mubr.bf16.mxu1 %v1354_v33 }
  0x42   :  { %471 = vmatmul.mubr.bf16.gmra.mrb[16].mxu0 %v1356_v34  ;;  %535 = vmatmul.mubr.bf16.gmra.mrb[16].mxu1 %v1357_v35 }
  0x43   :  { %478 = vmatprep.mubr.bf16.mxu0 %v1358_v36  ;;  %542 = vmatprep.mubr.bf16.mxu1 %v1360_v37 }
  0x4a   :  { %479 = vmatmul.mubr.bf16.gmra.mrb[20].mxu0 %v1362_v38  ;;  %543 = vmatmul.mubr.bf16.gmra.mrb[20].mxu1 %v1363_v39 }
  0x4b   :  { %486 = vmatprep.mubr.bf16.mxu0 %v1364_v40  ;;  %550 = vmatprep.mubr.bf16.mxu1 %v1366_v41 }
  0x52   :  { %487 = vmatmul.mubr.bf16.gmra.mrb[24].mxu0 %v1368_v42  ;;  %551 = vmatmul.mubr.bf16.gmra.mrb[24].mxu1 %v1369_v43 }
  0x53   :  { %494 = vmatprep.mubr.bf16.mxu0 %v1370_v44  ;;  %558 = vmatprep.mubr.bf16.mxu1 %v1372_v45 }
  0x5a   :  { %495 = vmatmul.mubr.bf16.gmra.mrb[28].mxu0 %v1374_v46  ;;  %559 = vmatmul.mubr.bf16.gmra.mrb[28].mxu1 %v1375_v47 }
  0xf5   :  { %v1197_v48 = vpop.f32.mrb[0].mxu0  ;;  %v1245_v49 = vpop.f32.mrb[0].mxu1 }
  0xf6   :  { %v1198_v50 = vpop.f32.mrb[1].mxu0  ;;  %v1246_v52 = vpop.f32.mrb[1].mxu1 }
  0xf7   :  { %v1199_v54 = vadd.f32 %v1198_v50, %v1197_v48  ;;  %v1247_v55 = vadd.f32 %v1246_v52, %v1245_v49  ;;  %v1200_v56 = vpop.f32.mrb[2].mxu0  ;;  %v1248_v57 = vpop.f32.mrb[2].mxu1 }
  0xf8   :  { %v1201_v58 = vpop.f32.mrb[3].mxu0  ;;  %v1249_v60 = vpop.f32.mrb[3].mxu1 }
  0xf9   :  { %v890_v62 = vadd.f32 %v1199_v54, %v826_v51  ;;  %v906_v63 = vadd.f32 %v1247_v55, %v842_v53  ;;  %v1202_v0 = vadd.f32 %v1201_v58, %v1200_v56  ;;  %v1250_v1 = vadd.f32 %v1249_v60, %v1248_v57 }
  0xfb   :  { %922 = vst [vmem:[%s1780_s4] sm:$0xff] %v890_v62  ;;  %938 = vst [vmem:[%s1780_s4 + $0x80] sm:$0xff] %v906_v63  ;;  %v1089_v2 = vpack.c.bf16 %v1202_v0, %v1199_v54  ;;  %v891_v3 = vadd.f32 %v1202_v0, %v827_v59  ;;  %v1129_v4 = vpack.c.bf16 %v1250_v1, %v1247_v55 }
  0xfc   :  { %v907_v5 = vadd.f32 %v1250_v1, %v843_v61 }
  0xfd   :  { %1090 = vst [vmem:[#allocation3] sm:$0xff] %v1089_v2   ;;  %923 = vst [vmem:[%s1780_s4 + $0x8] sm:$0xff] %v891_v3  ;;  %v1203_v6 = vpop.f32.mrb[4].mxu0  ;;  %v1251_v7 = vpop.f32.mrb[4].mxu1 }
  0xfe   :  { %1173 = vst [vmem:[#allocation3 + $0x40] sm:$0xff] %v1129_v4   ;;  %939 = vst [vmem:[%s1780_s4 + $0x88] sm:$0xff] %v907_v5  ;;  %v1204_v8 = vpop.f32.mrb[5].mxu0  ;;  %v1252_v10 = vpop.f32.mrb[5].mxu1 }
  0xff   :  { %v1205_v12 = vadd.f32 %v1204_v8, %v1203_v6  ;;  %v1253_v13 = vadd.f32 %v1252_v10, %v1251_v7  ;;  %v1206_v14 = vpop.f32.mrb[6].mxu0  ;;  %v1254_v15 = vpop.f32.mrb[6].mxu1 }
 0x100   :  { %v1207_v16 = vpop.f32.mrb[7].mxu0  ;;  %v1255_v18 = vpop.f32.mrb[7].mxu1 }
 0x101   :  { %v1208_v22 = vadd.f32 %v1207_v16, %v1206_v14  ;;  %v1256_v23 = vadd.f32 %v1255_v18, %v1254_v15 }
 0x103   :  { %v1094_v24 = vpack.c.bf16 %v1208_v22, %v1205_v12  ;;  %v1134_v26 = vpack.c.bf16 %v1256_v23, %v1253_v13 }
 0x105   :  { %v828_v9 = vld [vmem:[%s1778_s2 + $0x10] sm:$0xff]  ;;  %v829_v17 = vld [vmem:[%s1778_s2 + $0x18] sm:$0xff]  ;;  %1166 = vst [vmem:[#allocation3 + $0x8] sm:$0xff] %v1094_v24   ;;  %1174 = vst [vmem:[#allocation3 + $0x48] sm:$0xff] %v1134_v26   ;;  %v1209_v28 = vpop.f32.mrb[8].mxu0  ;;  %v1257_v29 = vpop.f32.mrb[8].mxu1 }
 0x106   :  { %v844_v11 = vld [vmem:[%s1778_s2 + $0x90] sm:$0xff]  ;;  %v845_v19 = vld [vmem:[%s1778_s2 + $0x98] sm:$0xff]  ;;  %v892_v20 = vadd.f32 %v1205_v12, %v828_v9  ;;  %v893_v25 = vadd.f32 %v1208_v22, %v829_v17  ;;  %v1210_v30 = vpop.f32.mrb[9].mxu0  ;;  %v1258_v32 = vpop.f32.mrb[9].mxu1 }
 0x107   :  { %v908_v21 = vadd.f32 %v1253_v13, %v844_v11  ;;  %v909_v27 = vadd.f32 %v1256_v23, %v845_v19  ;;  %v1211_v34 = vadd.f32 %v1210_v30, %v1209_v28  ;;  %v1259_v35 = vadd.f32 %v1258_v32, %v1257_v29  ;;  %v1212_v36 = vpop.f32.mrb[10].mxu0  ;;  %v1260_v37 = vpop.f32.mrb[10].mxu1 }
 0x108   :  { %924 = vst [vmem:[%s1780_s4 + $0x10] sm:$0xff] %v892_v20  ;;  %925 = vst [vmem:[%s1780_s4 + $0x18] sm:$0xff] %v893_v25  ;;  %v1213_v38 = vpop.f32.mrb[11].mxu0  ;;  %v1261_v40 = vpop.f32.mrb[11].mxu1 }
 0x109   :  { %940 = vst [vmem:[%s1780_s4 + $0x90] sm:$0xff] %v908_v21  ;;  %941 = vst [vmem:[%s1780_s4 + $0x98] sm:$0xff] %v909_v27  ;;  %v1214_v44 = vadd.f32 %v1213_v38, %v1212_v36  ;;  %v1262_v45 = vadd.f32 %v1261_v40, %v1260_v37 }
 0x10b   :  { %v1099_v46 = vpack.c.bf16 %v1214_v44, %v1211_v34  ;;  %v1139_v48 = vpack.c.bf16 %v1262_v45, %v1259_v35 }
 0x10d   :  { %1167 = vst [vmem:[#allocation3 + $0x10] sm:$0xff] %v1099_v46   ;;  %1175 = vst [vmem:[#allocation3 + $0x50] sm:$0xff] %v1139_v48   ;;  %v1215_v50 = vpop.f32.mrb[12].mxu0  ;;  %v1263_v51 = vpop.f32.mrb[12].mxu1 }
 0x10e   :  { %v1216_v52 = vpop.f32.mrb[13].mxu0  ;;  %v1264_v54 = vpop.f32.mrb[13].mxu1 }
 0x10f   :  { %v1217_v56 = vadd.f32 %v1216_v52, %v1215_v50  ;;  %v1265_v57 = vadd.f32 %v1264_v54, %v1263_v51  ;;  %v1218_v58 = vpop.f32.mrb[14].mxu0  ;;  %v1266_v59 = vpop.f32.mrb[14].mxu1 }
 0x110   :  { %v830_v31 = vld [vmem:[%s1778_s2 + $0x20] sm:$0xff]  ;;  %v831_v39 = vld [vmem:[%s1778_s2 + $0x28] sm:$0xff]  ;;  %v1219_v60 = vpop.f32.mrb[15].mxu0  ;;  %v1267_v62 = vpop.f32.mrb[15].mxu1 }
 0x111   :  { %v846_v33 = vld [vmem:[%s1778_s2 + $0xa0] sm:$0xff]  ;;  %v847_v41 = vld [vmem:[%s1778_s2 + $0xa8] sm:$0xff]  ;;  %v894_v42 = vadd.f32 %v1211_v34, %v830_v31  ;;  %v895_v47 = vadd.f32 %v1214_v44, %v831_v39  ;;  %v1220_v2 = vadd.f32 %v1219_v60, %v1218_v58  ;;  %v1268_v3 = vadd.f32 %v1267_v62, %v1266_v59 }
 0x112   :  { %v910_v43 = vadd.f32 %v1259_v35, %v846_v33  ;;  %v911_v49 = vadd.f32 %v1262_v45, %v847_v41 }
 0x113   :  { %926 = vst [vmem:[%s1780_s4 + $0x20] sm:$0xff] %v894_v42  ;;  %927 = vst [vmem:[%s1780_s4 + $0x28] sm:$0xff] %v895_v47  ;;  %v1104_v4 = vpack.c.bf16 %v1220_v2, %v1217_v56  ;;  %v1144_v6 = vpack.c.bf16 %v1268_v3, %v1265_v57 }
 0x114   :  { %942 = vst [vmem:[%s1780_s4 + $0xa0] sm:$0xff] %v910_v43  ;;  %943 = vst [vmem:[%s1780_s4 + $0xa8] sm:$0xff] %v911_v49 }
 0x115   :  { %1168 = vst [vmem:[#allocation3 + $0x18] sm:$0xff] %v1104_v4   ;;  %1176 = vst [vmem:[#allocation3 + $0x58] sm:$0xff] %v1144_v6   ;;  %v1221_v8 = vpop.f32.mrb[16].mxu0  ;;  %v1269_v9 = vpop.f32.mrb[16].mxu1 }
 0x116   :  { %v1222_v10 = vpop.f32.mrb[17].mxu0  ;;  %v1270_v12 = vpop.f32.mrb[17].mxu1 }
 0x117   :  { %v1223_v14 = vadd.f32 %v1222_v10, %v1221_v8  ;;  %v1271_v15 = vadd.f32 %v1270_v12, %v1269_v9  ;;  %v1224_v16 = vpop.f32.mrb[18].mxu0  ;;  %v1272_v17 = vpop.f32.mrb[18].mxu1 }
 0x118   :  { %v1225_v18 = vpop.f32.mrb[19].mxu0  ;;  %v1273_v20 = vpop.f32.mrb[19].mxu1 }
 0x119   :  { %v1226_v24 = vadd.f32 %v1225_v18, %v1224_v16  ;;  %v1274_v25 = vadd.f32 %v1273_v20, %v1272_v17 }
 0x11b   :  { %v832_v53 = vld [vmem:[%s1778_s2 + $0x30] sm:$0xff]  ;;  %v833_v61 = vld [vmem:[%s1778_s2 + $0x38] sm:$0xff]  ;;  %v1109_v26 = vpack.c.bf16 %v1226_v24, %v1223_v14  ;;  %v1149_v28 = vpack.c.bf16 %v1274_v25, %v1271_v15 }
 0x11c   :  { %v848_v55 = vld [vmem:[%s1778_s2 + $0xb0] sm:$0xff]  ;;  %v849_v63 = vld [vmem:[%s1778_s2 + $0xb8] sm:$0xff]  ;;  %v896_v0 = vadd.f32 %v1217_v56, %v832_v53  ;;  %v897_v5 = vadd.f32 %v1220_v2, %v833_v61 }
 0x11d   :  { %v912_v1 = vadd.f32 %v1265_v57, %v848_v55  ;;  %v913_v7 = vadd.f32 %v1268_v3, %v849_v63  ;;  %1169 = vst [vmem:[#allocation3 + $0x20] sm:$0xff] %v1109_v26   ;;  %1177 = vst [vmem:[#allocation3 + $0x60] sm:$0xff] %v1149_v28   ;;  %v1227_v30 = vpop.f32.mrb[20].mxu0  ;;  %v1275_v31 = vpop.f32.mrb[20].mxu1 }
 0x11e   :  { %928 = vst [vmem:[%s1780_s4 + $0x30] sm:$0xff] %v896_v0  ;;  %929 = vst [vmem:[%s1780_s4 + $0x38] sm:$0xff] %v897_v5  ;;  %v1228_v32 = vpop.f32.mrb[21].mxu0  ;;  %v1276_v34 = vpop.f32.mrb[21].mxu1 }
 0x11f   :  { %944 = vst [vmem:[%s1780_s4 + $0xb0] sm:$0xff] %v912_v1  ;;  %945 = vst [vmem:[%s1780_s4 + $0xb8] sm:$0xff] %v913_v7  ;;  %v1229_v36 = vadd.f32 %v1228_v32, %v1227_v30  ;;  %v1277_v37 = vadd.f32 %v1276_v34, %v1275_v31  ;;  %v1230_v38 = vpop.f32.mrb[22].mxu0  ;;  %v1278_v39 = vpop.f32.mrb[22].mxu1 }
 0x120   :  { %v1231_v40 = vpop.f32.mrb[23].mxu0  ;;  %v1279_v42 = vpop.f32.mrb[23].mxu1 }
 0x121   :  { %v1232_v46 = vadd.f32 %v1231_v40, %v1230_v38  ;;  %v1280_v47 = vadd.f32 %v1279_v42, %v1278_v39 }
 0x123   :  { %v1114_v48 = vpack.c.bf16 %v1232_v46, %v1229_v36  ;;  %v1154_v50 = vpack.c.bf16 %v1280_v47, %v1277_v37 }
 0x125   :  { %1170 = vst [vmem:[#allocation3 + $0x28] sm:$0xff] %v1114_v48   ;;  %1178 = vst [vmem:[#allocation3 + $0x68] sm:$0xff] %v1154_v50   ;;  %v1233_v52 = vpop.f32.mrb[24].mxu0  ;;  %v1281_v53 = vpop.f32.mrb[24].mxu1 }
 0x126   :  { %v834_v11 = vld [vmem:[%s1778_s2 + $0x40] sm:$0xff]  ;;  %v835_v19 = vld [vmem:[%s1778_s2 + $0x48] sm:$0xff]  ;;  %v1234_v54 = vpop.f32.mrb[25].mxu0  ;;  %v1282_v56 = vpop.f32.mrb[25].mxu1 }
 0x127   :  { %v850_v13 = vld [vmem:[%s1778_s2 + $0xc0] sm:$0xff]  ;;  %v851_v21 = vld [vmem:[%s1778_s2 + $0xc8] sm:$0xff]  ;;  %v898_v22 = vadd.f32 %v1223_v14, %v834_v11  ;;  %v899_v27 = vadd.f32 %v1226_v24, %v835_v19  ;;  %v1235_v58 = vadd.f32 %v1234_v54, %v1233_v52  ;;  %v1283_v59 = vadd.f32 %v1282_v56, %v1281_v53  ;;  %v1236_v60 = vpop.f32.mrb[26].mxu0  ;;  %v1284_v61 = vpop.f32.mrb[26].mxu1 }
 0x128   :  { %v914_v23 = vadd.f32 %v1271_v15, %v850_v13  ;;  %v915_v29 = vadd.f32 %v1274_v25, %v851_v21  ;;  %v1237_v62 = vpop.f32.mrb[27].mxu0  ;;  %v1285_v0 = vpop.f32.mrb[27].mxu1 }
 0x129   :  { %930 = vst [vmem:[%s1780_s4 + $0x40] sm:$0xff] %v898_v22  ;;  %931 = vst [vmem:[%s1780_s4 + $0x48] sm:$0xff] %v899_v27  ;;  %v1238_v4 = vadd.f32 %v1237_v62, %v1236_v60  ;;  %v1286_v5 = vadd.f32 %v1285_v0, %v1284_v61 }
 0x12a   :  { %946 = vst [vmem:[%s1780_s4 + $0xc0] sm:$0xff] %v914_v23  ;;  %947 = vst [vmem:[%s1780_s4 + $0xc8] sm:$0xff] %v915_v29 }
 0x12b   :  { %v1119_v6 = vpack.c.bf16 %v1238_v4, %v1235_v58  ;;  %v1159_v8 = vpack.c.bf16 %v1286_v5, %v1283_v59 }
 0x12d   :  { %1171 = vst [vmem:[#allocation3 + $0x30] sm:$0xff] %v1119_v6   ;;  %1179 = vst [vmem:[#allocation3 + $0x70] sm:$0xff] %v1159_v8   ;;  %v1239_v10 = vpop.f32.mrb[28].mxu0  ;;  %v1287_v11 = vpop.f32.mrb[28].mxu1 }
 0x12e   :  { %v1240_v12 = vpop.f32.mrb[29].mxu0  ;;  %v1288_v14 = vpop.f32.mrb[29].mxu1 }
 0x12f   :  { %v1241_v16 = vadd.f32 %v1240_v12, %v1239_v10  ;;  %v1289_v17 = vadd.f32 %v1288_v14, %v1287_v11  ;;  %v1242_v18 = vpop.f32.mrb[30].mxu0  ;;  %v1290_v19 = vpop.f32.mrb[30].mxu1 }
 0x130   :  { %v1243_v20 = vpop.f32.mrb[31].mxu0  ;;  %v1291_v22 = vpop.f32.mrb[31].mxu1 }
 0x131   :  { %v836_v33 = vld [vmem:[%s1778_s2 + $0x50] sm:$0xff]  ;;  %v837_v41 = vld [vmem:[%s1778_s2 + $0x58] sm:$0xff]  ;;  %v1244_v26 = vadd.f32 %v1243_v20, %v1242_v18  ;;  %v1292_v27 = vadd.f32 %v1291_v22, %v1290_v19 }
 0x132   :  { %v852_v35 = vld [vmem:[%s1778_s2 + $0xd0] sm:$0xff]  ;;  %v853_v43 = vld [vmem:[%s1778_s2 + $0xd8] sm:$0xff]  ;;  %v900_v44 = vadd.f32 %v1229_v36, %v836_v33  ;;  %v901_v49 = vadd.f32 %v1232_v46, %v837_v41 }
 0x133   :  { %v916_v45 = vadd.f32 %v1277_v37, %v852_v35  ;;  %v917_v51 = vadd.f32 %v1280_v47, %v853_v43  ;;  %v1124_v28 = vpack.c.bf16 %v1244_v26, %v1241_v16  ;;  %v1164_v30 = vpack.c.bf16 %v1292_v27, %v1289_v17 }
 0x134   :  { %932 = vst [vmem:[%s1780_s4 + $0x50] sm:$0xff] %v900_v44  ;;  %933 = vst [vmem:[%s1780_s4 + $0x58] sm:$0xff] %v901_v49 }
 0x135   :  { %948 = vst [vmem:[%s1780_s4 + $0xd0] sm:$0xff] %v916_v45  ;;  %949 = vst [vmem:[%s1780_s4 + $0xd8] sm:$0xff] %v917_v51 }
 0x136   :  { %1172 = vst [vmem:[#allocation3 + $0x38] sm:$0xff] %v1124_v28   ;;  %1180 = vst [vmem:[#allocation3 + $0x78] sm:$0xff] %v1164_v30  }
 0x13c   :  { %v838_v55 = vld [vmem:[%s1778_s2 + $0x60] sm:$0xff]  ;;  %v839_v63 = vld [vmem:[%s1778_s2 + $0x68] sm:$0xff] }
 0x13d   :  { %v854_v57 = vld [vmem:[%s1778_s2 + $0xe0] sm:$0xff]  ;;  %v855_v1 = vld [vmem:[%s1778_s2 + $0xe8] sm:$0xff]  ;;  %v902_v2 = vadd.f32 %v1235_v58, %v838_v55  ;;  %v903_v7 = vadd.f32 %v1238_v4, %v839_v63 }
 0x13e   :  { %v918_v3 = vadd.f32 %v1283_v59, %v854_v57  ;;  %v919_v9 = vadd.f32 %v1286_v5, %v855_v1 }
 0x13f   :  { %934 = vst [vmem:[%s1780_s4 + $0x60] sm:$0xff] %v902_v2  ;;  %935 = vst [vmem:[%s1780_s4 + $0x68] sm:$0xff] %v903_v7 }
 0x140   :  { %950 = vst [vmem:[%s1780_s4 + $0xe0] sm:$0xff] %v918_v3  ;;  %951 = vst [vmem:[%s1780_s4 + $0xe8] sm:$0xff] %v919_v9 }
 0x147   :  { %v840_v13 = vld [vmem:[%s1778_s2 + $0x70] sm:$0xff]  ;;  %v841_v21 = vld [vmem:[%s1778_s2 + $0x78] sm:$0xff] }
 0x148   :  { %v856_v15 = vld [vmem:[%s1778_s2 + $0xf0] sm:$0xff]  ;;  %v857_v23 = vld [vmem:[%s1778_s2 + $0xf8] sm:$0xff]  ;;  %v904_v24 = vadd.f32 %v1241_v16, %v840_v13  ;;  %v905_v29 = vadd.f32 %v1244_v26, %v841_v21 }
 0x149   :  { %v920_v25 = vadd.f32 %v1289_v17, %v856_v15  ;;  %v921_v31 = vadd.f32 %v1292_v27, %v857_v23 }
 0x14a   :  { %936 = vst [vmem:[%s1780_s4 + $0x70] sm:$0xff] %v904_v24  ;;  %937 = vst [vmem:[%s1780_s4 + $0x78] sm:$0xff] %v905_v29 }
 0x14b   :  { %952 = vst [vmem:[%s1780_s4 + $0xf0] sm:$0xff] %v920_v25  ;;  %953 = vst [vmem:[%s1780_s4 + $0xf8] sm:$0xff] %v921_v31 }
 0x14c   :  { %1387 = shalt.err (!%p1384_p4)
}
 0x14d   :  { %s1388_s23 = scalar_lea.hbm %s1779_s3, 2048 }
 0x14e   :  { %p1389_p5 = scmp.ne.s32.totalorder %s1779_s3, %s1388_s23  ;;  %p1392_p6 = scmp.lt.u32.totalorder %s1388_s23, %s1779_s3 }
 0x150   :  { %p1394_p7 = pnand %p1392_p6, %p1389_p5 }
 0x152   :  { %1397 = shalt.err (!%p1394_p7)
}
 0x153   :  { %s1401_s4 = smov 64   ;;  %s1402_s28 = smov 4  }
 0x154   :  { %965 = dma.vmem_to_hbm [thread:$0]  %s960_s8, 2048, %s1779_s3, [#allocation4], %s1401_s4, %s1401_s4, %s1402_s28  }
 0x155   :  { %1398 = dma.done.wait [#allocation4], 2048  }
 0x156   :  { %1399 = vsyncadd [#allocation4], 4294965248 }
 0x157   :  { %973 = vsyncpa [#allocation4], 1 }

// kernel: lightgcn_forward.4
= control target key start
LH: loop header
LB: loop body
LE: loop exit
PB: predicated region body
PF: predicated region fallthrough
CT: control target
= control target key end

     0   :  { %s1769_s1 = inlined_call_operand.vmem [shape: bf16[256,128], index: 1, kind: input, shape index: {}]   ;;  %s1770_s0 = inlined_call_operand.vmem [shape: bf16[256,256], index: 0, kind: input, shape index: {}]   ;;  %s1771_s2 = inlined_call_operand.vmem [shape: f32[256,128], index: 2, kind: input, shape index: {}, may-alias: {2,4}]   ;;  %s1772_s4 = inlined_call_operand.vmem [shape: f32[256,128], index: 4, kind: output, shape index: {1}, may-alias: {2,4}]   ;;  %s1773_s3 = inlined_call_operand.vmem [shape: bf16[256,128], index: 3, kind: output, shape index: {0}]  }
   0x1   :  { %v1296_v0 = vld [vmem:[%s1769_s1 + $0x40] sm:$0xff]   ;;  %v1298_v2 = vld [vmem:[%s1769_s1 + $0x48] sm:$0xff]   ;;  %v1300_v4 = vld [vmem:[%s1769_s1 + $0x50] sm:$0xff]  }
   0x2   :  { %v1297_v1 = vld [vmem:[%s1769_s1] sm:$0xff]   ;;  %1168 = vmatprep.subr.bf16.mxu0 %v1296_v0  ;;  %1280 = vmatprep.subr.bf16.mxu1 %v1296_v0  ;;  %v1299_v3 = vld [vmem:[%s1769_s1 + $0x8] sm:$0xff]   ;;  %v1301_v5 = vld [vmem:[%s1769_s1 + $0x10] sm:$0xff]  }
   0x3   :  { %1169 = vmatpush3.bf16.msra.mxu0 %v1297_v1  ;;  %1288 = vmatpush3.bf16.msra.mxu1 %v1297_v1  ;;  %v1302_v6 = vld [vmem:[%s1769_s1 + $0x58] sm:$0xff]   ;;  %v1304_v8 = vld [vmem:[%s1769_s1 + $0x60] sm:$0xff]   ;;  %v1306_v10 = vld [vmem:[%s1769_s1 + $0x68] sm:$0xff]  }
   0x4   :  { %1170 = vmatprep.subr.bf16.mxu0 %v1298_v2  ;;  %1281 = vmatprep.subr.bf16.mxu1 %v1298_v2  ;;  %v1303_v7 = vld [vmem:[%s1769_s1 + $0x18] sm:$0xff]   ;;  %v1305_v9 = vld [vmem:[%s1769_s1 + $0x20] sm:$0xff]   ;;  %v1307_v13 = vld [vmem:[%s1769_s1 + $0x28] sm:$0xff]  }
   0x5   :  { %v1314_v11 = vld [vmem:[%s1770_s0 + $0x4] ss:$8 sps:$4 sm:$0xff]   ;;  %v1308_v14 = vld [vmem:[%s1769_s1 + $0x70] sm:$0xff]   ;;  %v1310_v16 = vld [vmem:[%s1769_s1 + $0x78] sm:$0xff]  }
   0x6   :  { %v1317_v12 = vld [vmem:[%s1770_s0 + $0x84] ss:$8 sps:$4 sm:$0xff]   ;;  %437 = vmatprep.mubr.bf16.mxu0 %v1314_v11  ;;  %v1309_v15 = vld [vmem:[%s1769_s1 + $0x30] sm:$0xff]   ;;  %v1311_v17 = vld [vmem:[%s1769_s1 + $0x38] sm:$0xff]  }
   0x7   :  { %1171 = vmatpush3.bf16.msra.mxu0 %v1299_v3  ;;  %1289 = vmatpush3.bf16.msra.mxu1 %v1299_v3  ;;  %v1312_v18 = vld [vmem:[%s1770_s0] ss:$8 sps:$4 sm:$0xff]   ;;  %v1318_v20 = vld [vmem:[%s1770_s0 + $0x14] ss:$8 sps:$4 sm:$0xff]   ;;  %v1322_v22 = vld [vmem:[%s1770_s0 + $0x10] ss:$8 sps:$4 sm:$0xff]  }
   0x8   :  { %1172 = vmatprep.subr.bf16.mxu0 %v1300_v4  ;;  %1282 = vmatprep.subr.bf16.mxu1 %v1300_v4  ;;  %v1315_v19 = vld [vmem:[%s1770_s0 + $0x80] ss:$8 sps:$4 sm:$0xff]   ;;  %v1320_v21 = vld [vmem:[%s1770_s0 + $0x94] ss:$8 sps:$4 sm:$0xff]   ;;  %v1323_v23 = vld [vmem:[%s1770_s0 + $0x90] ss:$8 sps:$4 sm:$0xff]  }
   0x9   :  { %501 = vmatprep.mubr.bf16.mxu1 %v1317_v12  ;;  %v1324_v24 = vld [vmem:[%s1770_s0 + $0x24] ss:$8 sps:$4 sm:$0xff]   ;;  %v1328_v26 = vld [vmem:[%s1770_s0 + $0x20] ss:$8 sps:$4 sm:$0xff]   ;;  %v1330_v28 = vld [vmem:[%s1770_s0 + $0x34] ss:$8 sps:$4 sm:$0xff]  }
   0xa   :  { %v1326_v25 = vld [vmem:[%s1770_s0 + $0xa4] ss:$8 sps:$4 sm:$0xff]   ;;  %v1329_v27 = vld [vmem:[%s1770_s0 + $0xa0] ss:$8 sps:$4 sm:$0xff]   ;;  %v1332_v29 = vld [vmem:[%s1770_s0 + $0xb4] ss:$8 sps:$4 sm:$0xff]  }
   0xb   :  { %1173 = vmatpush3.bf16.msra.mxu0 %v1301_v5  ;;  %1290 = vmatpush3.bf16.msra.mxu1 %v1301_v5  ;;  %v1334_v30 = vld [vmem:[%s1770_s0 + $0x30] ss:$8 sps:$4 sm:$0xff]   ;;  %v1336_v32 = vld [vmem:[%s1770_s0 + $0x44] ss:$8 sps:$4 sm:$0xff]   ;;  %v1340_v34 = vld [vmem:[%s1770_s0 + $0x40] ss:$8 sps:$4 sm:$0xff]  }
   0xc   :  { %1174 = vmatprep.subr.bf16.mxu0 %v1302_v6  ;;  %1283 = vmatprep.subr.bf16.mxu1 %v1302_v6  ;;  %v1335_v31 = vld [vmem:[%s1770_s0 + $0xb0] ss:$8 sps:$4 sm:$0xff]   ;;  %v1338_v33 = vld [vmem:[%s1770_s0 + $0xc4] ss:$8 sps:$4 sm:$0xff]   ;;  %v1341_v35 = vld [vmem:[%s1770_s0 + $0xc0] ss:$8 sps:$4 sm:$0xff]  }
   0xd   :  { %v1342_v36 = vld [vmem:[%s1770_s0 + $0x54] ss:$8 sps:$4 sm:$0xff]   ;;  %v1346_v38 = vld [vmem:[%s1770_s0 + $0x50] ss:$8 sps:$4 sm:$0xff]   ;;  %v1348_v40 = vld [vmem:[%s1770_s0 + $0x64] ss:$8 sps:$4 sm:$0xff]  }
   0xe   :  { %v1344_v37 = vld [vmem:[%s1770_s0 + $0xd4] ss:$8 sps:$4 sm:$0xff]   ;;  %v1347_v39 = vld [vmem:[%s1770_s0 + $0xd0] ss:$8 sps:$4 sm:$0xff]   ;;  %v1350_v41 = vld [vmem:[%s1770_s0 + $0xe4] ss:$8 sps:$4 sm:$0xff]  }
   0xf   :  { %1175 = vmatpush3.bf16.msra.mxu0 %v1303_v7  ;;  %1291 = vmatpush3.bf16.msra.mxu1 %v1303_v7  ;;  %v1352_v42 = vld [vmem:[%s1770_s0 + $0x60] ss:$8 sps:$4 sm:$0xff]   ;;  %v1354_v44 = vld [vmem:[%s1770_s0 + $0x74] ss:$8 sps:$4 sm:$0xff]   ;;  %v1358_v46 = vld [vmem:[%s1770_s0 + $0x70] ss:$8 sps:$4 sm:$0xff]  }
  0x10   :  { %1176 = vmatprep.subr.bf16.mxu0 %v1304_v8  ;;  %1284 = vmatprep.subr.bf16.mxu1 %v1304_v8  ;;  %v1353_v43 = vld [vmem:[%s1770_s0 + $0xe0] ss:$8 sps:$4 sm:$0xff]   ;;  %v1356_v45 = vld [vmem:[%s1770_s0 + $0xf4] ss:$8 sps:$4 sm:$0xff]   ;;  %v1359_v47 = vld [vmem:[%s1770_s0 + $0xf0] ss:$8 sps:$4 sm:$0xff]  }
  0x11   :  { %v825_v51 = vld [vmem:[%s1771_s2] sm:$0xff]  ;;  %v826_v59 = vld [vmem:[%s1771_s2 + $0x8] sm:$0xff] }
  0x12   :  { %v841_v53 = vld [vmem:[%s1771_s2 + $0x80] sm:$0xff]  ;;  %v842_v61 = vld [vmem:[%s1771_s2 + $0x88] sm:$0xff] }
  0x13   :  { %1177 = vmatpush3.bf16.msra.mxu0 %v1305_v9  ;;  %1292 = vmatpush3.bf16.msra.mxu1 %v1305_v9 }
  0x14   :  { %1178 = vmatprep.subr.bf16.mxu0 %v1306_v10  ;;  %1285 = vmatprep.subr.bf16.mxu1 %v1306_v10 }
  0x17   :  { %1179 = vmatpush3.bf16.msra.mxu0 %v1307_v13  ;;  %1293 = vmatpush3.bf16.msra.mxu1 %v1307_v13 }
  0x18   :  { %1180 = vmatprep.subr.bf16.mxu0 %v1308_v14  ;;  %1286 = vmatprep.subr.bf16.mxu1 %v1308_v14 }
  0x1b   :  { %1181 = vmatpush3.bf16.msra.mxu0 %v1309_v15  ;;  %1294 = vmatpush3.bf16.msra.mxu1 %v1309_v15 }
  0x1c   :  { %1182 = vmatprep.subr.bf16.mxu0 %v1310_v16  ;;  %1287 = vmatprep.subr.bf16.mxu1 %v1310_v16 }
  0x1f   :  { %1183 = vmatpush3.bf16.msra.mxu0 %v1311_v17  ;;  %1295 = vmatpush3.bf16.msra.mxu1 %v1311_v17 }
  0x22   :  { %438 = vmatmul.mubr.bf16.vlgmr.msra.gmra.mrb[0].mxu0 %v1312_v18  ;;  %502 = vmatmul.mubr.bf16.vlgmr.msra.gmra.mrb[0].mxu1 %v1315_v19 }
  0x23   :  { %445 = vmatprep.mubr.bf16.mxu0 %v1318_v20  ;;  %509 = vmatprep.mubr.bf16.mxu1 %v1320_v21 }
  0x2a   :  { %446 = vmatmul.mubr.bf16.gmra.mrb[4].mxu0 %v1322_v22  ;;  %510 = vmatmul.mubr.bf16.gmra.mrb[4].mxu1 %v1323_v23 }
  0x2b   :  { %453 = vmatprep.mubr.bf16.mxu0 %v1324_v24  ;;  %517 = vmatprep.mubr.bf16.mxu1 %v1326_v25 }
  0x32   :  { %454 = vmatmul.mubr.bf16.gmra.mrb[8].mxu0 %v1328_v26  ;;  %518 = vmatmul.mubr.bf16.gmra.mrb[8].mxu1 %v1329_v27 }
  0x33   :  { %461 = vmatprep.mubr.bf16.mxu0 %v1330_v28  ;;  %525 = vmatprep.mubr.bf16.mxu1 %v1332_v29 }
  0x3a   :  { %462 = vmatmul.mubr.bf16.gmra.mrb[12].mxu0 %v1334_v30  ;;  %526 = vmatmul.mubr.bf16.gmra.mrb[12].mxu1 %v1335_v31 }
  0x3b   :  { %469 = vmatprep.mubr.bf16.mxu0 %v1336_v32  ;;  %533 = vmatprep.mubr.bf16.mxu1 %v1338_v33 }
  0x42   :  { %470 = vmatmul.mubr.bf16.gmra.mrb[16].mxu0 %v1340_v34  ;;  %534 = vmatmul.mubr.bf16.gmra.mrb[16].mxu1 %v1341_v35 }
  0x43   :  { %477 = vmatprep.mubr.bf16.mxu0 %v1342_v36  ;;  %541 = vmatprep.mubr.bf16.mxu1 %v1344_v37 }
  0x4a   :  { %478 = vmatmul.mubr.bf16.gmra.mrb[20].mxu0 %v1346_v38  ;;  %542 = vmatmul.mubr.bf16.gmra.mrb[20].mxu1 %v1347_v39 }
  0x4b   :  { %485 = vmatprep.mubr.bf16.mxu0 %v1348_v40  ;;  %549 = vmatprep.mubr.bf16.mxu1 %v1350_v41 }
  0x52   :  { %486 = vmatmul.mubr.bf16.gmra.mrb[24].mxu0 %v1352_v42  ;;  %550 = vmatmul.mubr.bf16.gmra.mrb[24].mxu1 %v1353_v43 }
  0x53   :  { %493 = vmatprep.mubr.bf16.mxu0 %v1354_v44  ;;  %557 = vmatprep.mubr.bf16.mxu1 %v1356_v45 }
  0x5a   :  { %494 = vmatmul.mubr.bf16.gmra.mrb[28].mxu0 %v1358_v46  ;;  %558 = vmatmul.mubr.bf16.gmra.mrb[28].mxu1 %v1359_v47 }
  0xf5   :  { %v1184_v48 = vpop.f32.mrb[0].mxu0  ;;  %v1232_v49 = vpop.f32.mrb[0].mxu1 }
  0xf6   :  { %v1185_v50 = vpop.f32.mrb[1].mxu0  ;;  %v1233_v52 = vpop.f32.mrb[1].mxu1 }
  0xf7   :  { %v1186_v54 = vadd.f32 %v1185_v50, %v1184_v48  ;;  %v1234_v55 = vadd.f32 %v1233_v52, %v1232_v49  ;;  %v1187_v56 = vpop.f32.mrb[2].mxu0  ;;  %v1235_v57 = vpop.f32.mrb[2].mxu1 }
  0xf8   :  { %v1188_v58 = vpop.f32.mrb[3].mxu0  ;;  %v1236_v60 = vpop.f32.mrb[3].mxu1 }
  0xf9   :  { %v889_v62 = vadd.f32 %v1186_v54, %v825_v51  ;;  %v905_v63 = vadd.f32 %v1234_v55, %v841_v53  ;;  %v1189_v0 = vadd.f32 %v1188_v58, %v1187_v56  ;;  %v1237_v1 = vadd.f32 %v1236_v60, %v1235_v57 }
  0xfb   :  { %921 = vst [vmem:[%s1772_s4] sm:$0xff] %v889_v62  ;;  %937 = vst [vmem:[%s1772_s4 + $0x80] sm:$0xff] %v905_v63  ;;  %v1076_v2 = vpack.c.bf16 %v1189_v0, %v1186_v54  ;;  %v890_v3 = vadd.f32 %v1189_v0, %v826_v59  ;;  %v1116_v4 = vpack.c.bf16 %v1237_v1, %v1234_v55 }
  0xfc   :  { %v906_v5 = vadd.f32 %v1237_v1, %v842_v61 }
  0xfd   :  { %1077 = vst [vmem:[%s1773_s3] sm:$0xff] %v1076_v2   ;;  %922 = vst [vmem:[%s1772_s4 + $0x8] sm:$0xff] %v890_v3  ;;  %v1190_v6 = vpop.f32.mrb[4].mxu0  ;;  %v1238_v7 = vpop.f32.mrb[4].mxu1 }
  0xfe   :  { %1160 = vst [vmem:[%s1773_s3 + $0x40] sm:$0xff] %v1116_v4   ;;  %938 = vst [vmem:[%s1772_s4 + $0x88] sm:$0xff] %v906_v5  ;;  %v1191_v8 = vpop.f32.mrb[5].mxu0  ;;  %v1239_v10 = vpop.f32.mrb[5].mxu1 }
  0xff   :  { %v1192_v12 = vadd.f32 %v1191_v8, %v1190_v6  ;;  %v1240_v13 = vadd.f32 %v1239_v10, %v1238_v7  ;;  %v1193_v14 = vpop.f32.mrb[6].mxu0  ;;  %v1241_v15 = vpop.f32.mrb[6].mxu1 }
 0x100   :  { %v1194_v16 = vpop.f32.mrb[7].mxu0  ;;  %v1242_v18 = vpop.f32.mrb[7].mxu1 }
 0x101   :  { %v1195_v22 = vadd.f32 %v1194_v16, %v1193_v14  ;;  %v1243_v23 = vadd.f32 %v1242_v18, %v1241_v15 }
 0x103   :  { %v1081_v24 = vpack.c.bf16 %v1195_v22, %v1192_v12  ;;  %v1121_v26 = vpack.c.bf16 %v1243_v23, %v1240_v13 }
 0x105   :  { %v827_v9 = vld [vmem:[%s1771_s2 + $0x10] sm:$0xff]  ;;  %v828_v17 = vld [vmem:[%s1771_s2 + $0x18] sm:$0xff]  ;;  %1153 = vst [vmem:[%s1773_s3 + $0x8] sm:$0xff] %v1081_v24   ;;  %1161 = vst [vmem:[%s1773_s3 + $0x48] sm:$0xff] %v1121_v26   ;;  %v1196_v28 = vpop.f32.mrb[8].mxu0  ;;  %v1244_v29 = vpop.f32.mrb[8].mxu1 }
 0x106   :  { %v843_v11 = vld [vmem:[%s1771_s2 + $0x90] sm:$0xff]  ;;  %v844_v19 = vld [vmem:[%s1771_s2 + $0x98] sm:$0xff]  ;;  %v891_v20 = vadd.f32 %v1192_v12, %v827_v9  ;;  %v892_v25 = vadd.f32 %v1195_v22, %v828_v17  ;;  %v1197_v30 = vpop.f32.mrb[9].mxu0  ;;  %v1245_v32 = vpop.f32.mrb[9].mxu1 }
 0x107   :  { %v907_v21 = vadd.f32 %v1240_v13, %v843_v11  ;;  %v908_v27 = vadd.f32 %v1243_v23, %v844_v19  ;;  %v1198_v34 = vadd.f32 %v1197_v30, %v1196_v28  ;;  %v1246_v35 = vadd.f32 %v1245_v32, %v1244_v29  ;;  %v1199_v36 = vpop.f32.mrb[10].mxu0  ;;  %v1247_v37 = vpop.f32.mrb[10].mxu1 }
 0x108   :  { %923 = vst [vmem:[%s1772_s4 + $0x10] sm:$0xff] %v891_v20  ;;  %924 = vst [vmem:[%s1772_s4 + $0x18] sm:$0xff] %v892_v25  ;;  %v1200_v38 = vpop.f32.mrb[11].mxu0  ;;  %v1248_v40 = vpop.f32.mrb[11].mxu1 }
 0x109   :  { %939 = vst [vmem:[%s1772_s4 + $0x90] sm:$0xff] %v907_v21  ;;  %940 = vst [vmem:[%s1772_s4 + $0x98] sm:$0xff] %v908_v27  ;;  %v1201_v44 = vadd.f32 %v1200_v38, %v1199_v36  ;;  %v1249_v45 = vadd.f32 %v1248_v40, %v1247_v37 }
 0x10b   :  { %v1086_v46 = vpack.c.bf16 %v1201_v44, %v1198_v34  ;;  %v1126_v48 = vpack.c.bf16 %v1249_v45, %v1246_v35 }
 0x10d   :  { %1154 = vst [vmem:[%s1773_s3 + $0x10] sm:$0xff] %v1086_v46   ;;  %1162 = vst [vmem:[%s1773_s3 + $0x50] sm:$0xff] %v1126_v48   ;;  %v1202_v50 = vpop.f32.mrb[12].mxu0  ;;  %v1250_v51 = vpop.f32.mrb[12].mxu1 }
 0x10e   :  { %v1203_v52 = vpop.f32.mrb[13].mxu0  ;;  %v1251_v54 = vpop.f32.mrb[13].mxu1 }
 0x10f   :  { %v1204_v56 = vadd.f32 %v1203_v52, %v1202_v50  ;;  %v1252_v57 = vadd.f32 %v1251_v54, %v1250_v51  ;;  %v1205_v58 = vpop.f32.mrb[14].mxu0  ;;  %v1253_v59 = vpop.f32.mrb[14].mxu1 }
 0x110   :  { %v829_v31 = vld [vmem:[%s1771_s2 + $0x20] sm:$0xff]  ;;  %v830_v39 = vld [vmem:[%s1771_s2 + $0x28] sm:$0xff]  ;;  %v1206_v60 = vpop.f32.mrb[15].mxu0  ;;  %v1254_v62 = vpop.f32.mrb[15].mxu1 }
 0x111   :  { %v845_v33 = vld [vmem:[%s1771_s2 + $0xa0] sm:$0xff]  ;;  %v846_v41 = vld [vmem:[%s1771_s2 + $0xa8] sm:$0xff]  ;;  %v893_v42 = vadd.f32 %v1198_v34, %v829_v31  ;;  %v894_v47 = vadd.f32 %v1201_v44, %v830_v39  ;;  %v1207_v2 = vadd.f32 %v1206_v60, %v1205_v58  ;;  %v1255_v3 = vadd.f32 %v1254_v62, %v1253_v59 }
 0x112   :  { %v909_v43 = vadd.f32 %v1246_v35, %v845_v33  ;;  %v910_v49 = vadd.f32 %v1249_v45, %v846_v41 }
 0x113   :  { %925 = vst [vmem:[%s1772_s4 + $0x20] sm:$0xff] %v893_v42  ;;  %926 = vst [vmem:[%s1772_s4 + $0x28] sm:$0xff] %v894_v47  ;;  %v1091_v4 = vpack.c.bf16 %v1207_v2, %v1204_v56  ;;  %v1131_v6 = vpack.c.bf16 %v1255_v3, %v1252_v57 }
 0x114   :  { %941 = vst [vmem:[%s1772_s4 + $0xa0] sm:$0xff] %v909_v43  ;;  %942 = vst [vmem:[%s1772_s4 + $0xa8] sm:$0xff] %v910_v49 }
 0x115   :  { %1155 = vst [vmem:[%s1773_s3 + $0x18] sm:$0xff] %v1091_v4   ;;  %1163 = vst [vmem:[%s1773_s3 + $0x58] sm:$0xff] %v1131_v6   ;;  %v1208_v8 = vpop.f32.mrb[16].mxu0  ;;  %v1256_v9 = vpop.f32.mrb[16].mxu1 }
 0x116   :  { %v1209_v10 = vpop.f32.mrb[17].mxu0  ;;  %v1257_v12 = vpop.f32.mrb[17].mxu1 }
 0x117   :  { %v1210_v14 = vadd.f32 %v1209_v10, %v1208_v8  ;;  %v1258_v15 = vadd.f32 %v1257_v12, %v1256_v9  ;;  %v1211_v16 = vpop.f32.mrb[18].mxu0  ;;  %v1259_v17 = vpop.f32.mrb[18].mxu1 }
 0x118   :  { %v1212_v18 = vpop.f32.mrb[19].mxu0  ;;  %v1260_v20 = vpop.f32.mrb[19].mxu1 }
 0x119   :  { %v1213_v24 = vadd.f32 %v1212_v18, %v1211_v16  ;;  %v1261_v25 = vadd.f32 %v1260_v20, %v1259_v17 }
 0x11b   :  { %v831_v53 = vld [vmem:[%s1771_s2 + $0x30] sm:$0xff]  ;;  %v832_v61 = vld [vmem:[%s1771_s2 + $0x38] sm:$0xff]  ;;  %v1096_v26 = vpack.c.bf16 %v1213_v24, %v1210_v14  ;;  %v1136_v28 = vpack.c.bf16 %v1261_v25, %v1258_v15 }
 0x11c   :  { %v847_v55 = vld [vmem:[%s1771_s2 + $0xb0] sm:$0xff]  ;;  %v848_v63 = vld [vmem:[%s1771_s2 + $0xb8] sm:$0xff]  ;;  %v895_v0 = vadd.f32 %v1204_v56, %v831_v53  ;;  %v896_v5 = vadd.f32 %v1207_v2, %v832_v61 }
 0x11d   :  { %v911_v1 = vadd.f32 %v1252_v57, %v847_v55  ;;  %v912_v7 = vadd.f32 %v1255_v3, %v848_v63  ;;  %1156 = vst [vmem:[%s1773_s3 + $0x20] sm:$0xff] %v1096_v26   ;;  %1164 = vst [vmem:[%s1773_s3 + $0x60] sm:$0xff] %v1136_v28   ;;  %v1214_v30 = vpop.f32.mrb[20].mxu0  ;;  %v1262_v31 = vpop.f32.mrb[20].mxu1 }
 0x11e   :  { %927 = vst [vmem:[%s1772_s4 + $0x30] sm:$0xff] %v895_v0  ;;  %928 = vst [vmem:[%s1772_s4 + $0x38] sm:$0xff] %v896_v5  ;;  %v1215_v32 = vpop.f32.mrb[21].mxu0  ;;  %v1263_v34 = vpop.f32.mrb[21].mxu1 }
 0x11f   :  { %943 = vst [vmem:[%s1772_s4 + $0xb0] sm:$0xff] %v911_v1  ;;  %944 = vst [vmem:[%s1772_s4 + $0xb8] sm:$0xff] %v912_v7  ;;  %v1216_v36 = vadd.f32 %v1215_v32, %v1214_v30  ;;  %v1264_v37 = vadd.f32 %v1263_v34, %v1262_v31  ;;  %v1217_v38 = vpop.f32.mrb[22].mxu0  ;;  %v1265_v39 = vpop.f32.mrb[22].mxu1 }
 0x120   :  { %v1218_v40 = vpop.f32.mrb[23].mxu0  ;;  %v1266_v42 = vpop.f32.mrb[23].mxu1 }
 0x121   :  { %v1219_v46 = vadd.f32 %v1218_v40, %v1217_v38  ;;  %v1267_v47 = vadd.f32 %v1266_v42, %v1265_v39 }
 0x123   :  { %v1101_v48 = vpack.c.bf16 %v1219_v46, %v1216_v36  ;;  %v1141_v50 = vpack.c.bf16 %v1267_v47, %v1264_v37 }
 0x125   :  { %1157 = vst [vmem:[%s1773_s3 + $0x28] sm:$0xff] %v1101_v48   ;;  %1165 = vst [vmem:[%s1773_s3 + $0x68] sm:$0xff] %v1141_v50   ;;  %v1220_v52 = vpop.f32.mrb[24].mxu0  ;;  %v1268_v53 = vpop.f32.mrb[24].mxu1 }
 0x126   :  { %v833_v11 = vld [vmem:[%s1771_s2 + $0x40] sm:$0xff]  ;;  %v834_v19 = vld [vmem:[%s1771_s2 + $0x48] sm:$0xff]  ;;  %v1221_v54 = vpop.f32.mrb[25].mxu0  ;;  %v1269_v56 = vpop.f32.mrb[25].mxu1 }
 0x127   :  { %v849_v13 = vld [vmem:[%s1771_s2 + $0xc0] sm:$0xff]  ;;  %v850_v21 = vld [vmem:[%s1771_s2 + $0xc8] sm:$0xff]  ;;  %v897_v22 = vadd.f32 %v1210_v14, %v833_v11  ;;  %v898_v27 = vadd.f32 %v1213_v24, %v834_v19  ;;  %v1222_v58 = vadd.f32 %v1221_v54, %v1220_v52  ;;  %v1270_v59 = vadd.f32 %v1269_v56, %v1268_v53  ;;  %v1223_v60 = vpop.f32.mrb[26].mxu0  ;;  %v1271_v61 = vpop.f32.mrb[26].mxu1 }
 0x128   :  { %v913_v23 = vadd.f32 %v1258_v15, %v849_v13  ;;  %v914_v29 = vadd.f32 %v1261_v25, %v850_v21  ;;  %v1224_v62 = vpop.f32.mrb[27].mxu0  ;;  %v1272_v0 = vpop.f32.mrb[27].mxu1 }
 0x129   :  { %929 = vst [vmem:[%s1772_s4 + $0x40] sm:$0xff] %v897_v22  ;;  %930 = vst [vmem:[%s1772_s4 + $0x48] sm:$0xff] %v898_v27  ;;  %v1225_v4 = vadd.f32 %v1224_v62, %v1223_v60  ;;  %v1273_v5 = vadd.f32 %v1272_v0, %v1271_v61 }
 0x12a   :  { %945 = vst [vmem:[%s1772_s4 + $0xc0] sm:$0xff] %v913_v23  ;;  %946 = vst [vmem:[%s1772_s4 + $0xc8] sm:$0xff] %v914_v29 }
 0x12b   :  { %v1106_v6 = vpack.c.bf16 %v1225_v4, %v1222_v58  ;;  %v1146_v8 = vpack.c.bf16 %v1273_v5, %v1270_v59 }
 0x12d   :  { %1158 = vst [vmem:[%s1773_s3 + $0x30] sm:$0xff] %v1106_v6   ;;  %1166 = vst [vmem:[%s1773_s3 + $0x70] sm:$0xff] %v1146_v8   ;;  %v1226_v10 = vpop.f32.mrb[28].mxu0  ;;  %v1274_v11 = vpop.f32.mrb[28].mxu1 }
 0x12e   :  { %v1227_v12 = vpop.f32.mrb[29].mxu0  ;;  %v1275_v14 = vpop.f32.mrb[29].mxu1 }
 0x12f   :  { %v1228_v16 = vadd.f32 %v1227_v12, %v1226_v10  ;;  %v1276_v17 = vadd.f32 %v1275_v14, %v1274_v11  ;;  %v1229_v18 = vpop.f32.mrb[30].mxu0  ;;  %v1277_v19 = vpop.f32.mrb[30].mxu1 }
 0x130   :  { %v1230_v20 = vpop.f32.mrb[31].mxu0  ;;  %v1278_v22 = vpop.f32.mrb[31].mxu1 }
 0x131   :  { %v835_v33 = vld [vmem:[%s1771_s2 + $0x50] sm:$0xff]  ;;  %v836_v41 = vld [vmem:[%s1771_s2 + $0x58] sm:$0xff]  ;;  %v1231_v26 = vadd.f32 %v1230_v20, %v1229_v18  ;;  %v1279_v27 = vadd.f32 %v1278_v22, %v1277_v19 }
 0x132   :  { %v851_v35 = vld [vmem:[%s1771_s2 + $0xd0] sm:$0xff]  ;;  %v852_v43 = vld [vmem:[%s1771_s2 + $0xd8] sm:$0xff]  ;;  %v899_v44 = vadd.f32 %v1216_v36, %v835_v33  ;;  %v900_v49 = vadd.f32 %v1219_v46, %v836_v41 }
 0x133   :  { %v915_v45 = vadd.f32 %v1264_v37, %v851_v35  ;;  %v916_v51 = vadd.f32 %v1267_v47, %v852_v43  ;;  %v1111_v28 = vpack.c.bf16 %v1231_v26, %v1228_v16  ;;  %v1151_v30 = vpack.c.bf16 %v1279_v27, %v1276_v17 }
 0x134   :  { %931 = vst [vmem:[%s1772_s4 + $0x50] sm:$0xff] %v899_v44  ;;  %932 = vst [vmem:[%s1772_s4 + $0x58] sm:$0xff] %v900_v49 }
 0x135   :  { %947 = vst [vmem:[%s1772_s4 + $0xd0] sm:$0xff] %v915_v45  ;;  %948 = vst [vmem:[%s1772_s4 + $0xd8] sm:$0xff] %v916_v51 }
 0x136   :  { %1159 = vst [vmem:[%s1773_s3 + $0x38] sm:$0xff] %v1111_v28   ;;  %1167 = vst [vmem:[%s1773_s3 + $0x78] sm:$0xff] %v1151_v30  }
 0x13c   :  { %v837_v55 = vld [vmem:[%s1771_s2 + $0x60] sm:$0xff]  ;;  %v838_v63 = vld [vmem:[%s1771_s2 + $0x68] sm:$0xff] }
 0x13d   :  { %v853_v57 = vld [vmem:[%s1771_s2 + $0xe0] sm:$0xff]  ;;  %v854_v1 = vld [vmem:[%s1771_s2 + $0xe8] sm:$0xff]  ;;  %v901_v2 = vadd.f32 %v1222_v58, %v837_v55  ;;  %v902_v7 = vadd.f32 %v1225_v4, %v838_v63 }
 0x13e   :  { %v917_v3 = vadd.f32 %v1270_v59, %v853_v57  ;;  %v918_v9 = vadd.f32 %v1273_v5, %v854_v1 }
 0x13f   :  { %933 = vst [vmem:[%s1772_s4 + $0x60] sm:$0xff] %v901_v2  ;;  %934 = vst [vmem:[%s1772_s4 + $0x68] sm:$0xff] %v902_v7 }
 0x140   :  { %949 = vst [vmem:[%s1772_s4 + $0xe0] sm:$0xff] %v917_v3  ;;  %950 = vst [vmem:[%s1772_s4 + $0xe8] sm:$0xff] %v918_v9 }
 0x147   :  { %v839_v13 = vld [vmem:[%s1771_s2 + $0x70] sm:$0xff]  ;;  %v840_v21 = vld [vmem:[%s1771_s2 + $0x78] sm:$0xff] }
 0x148   :  { %v855_v15 = vld [vmem:[%s1771_s2 + $0xf0] sm:$0xff]  ;;  %v856_v23 = vld [vmem:[%s1771_s2 + $0xf8] sm:$0xff]  ;;  %v903_v24 = vadd.f32 %v1228_v16, %v839_v13  ;;  %v904_v29 = vadd.f32 %v1231_v26, %v840_v21 }
 0x149   :  { %v919_v25 = vadd.f32 %v1276_v17, %v855_v15  ;;  %v920_v31 = vadd.f32 %v1279_v27, %v856_v23 }
 0x14a   :  { %935 = vst [vmem:[%s1772_s4 + $0x70] sm:$0xff] %v903_v24  ;;  %936 = vst [vmem:[%s1772_s4 + $0x78] sm:$0xff] %v904_v29 }
 0x14b   :  { %951 = vst [vmem:[%s1772_s4 + $0xf0] sm:$0xff] %v919_v25  ;;  %952 = vst [vmem:[%s1772_s4 + $0xf8] sm:$0xff] %v920_v31 }

</bundles_post_ra>
